<compile_context>
chip_gen: v6e
topology: v6e:2x2x1
jax: 0.10.0
libtpu: 0.0.40
codegen_flags: <defaults>
</compile_context>

<pallas_src>
import jax
import jax.numpy as jnp
from jax import lax
from jax.experimental import pallas as pl
from jax.experimental.pallas import tpu as pltpu

MARGIN = 0.3
_BIG = 1e30  # sentinel instead of +/- inf for masked reductions


def _make_triplet_kernel(margin, inv_n):
    def kernel(x_ref, tcol_ref, trow_ref, loss_ref, correct_ref, gram_ref, sq_ref):
        k = pl.program_id(0)

        @pl.when(k == 0)
        def _init():
            gram_ref[...] = jnp.zeros_like(gram_ref)
            sq_ref[...] = jnp.zeros_like(sq_ref)

        # Gram slab on the MXU: contract both operands on the feature axis so
        # no transpose of x is materialized; accumulate in f32.
        xk = x_ref[...]
        gram_ref[...] += lax.dot_general(
            xk, xk,
            dimension_numbers=(((1,), (1,)), ((), ())),
            preferred_element_type=jnp.float32)

        # Per-slab squared-norm accumulation in f32 (hides under MXU/DMA slack).
        xk_f32 = xk.astype(jnp.float32)
        sq_ref[...] += jnp.sum(xk_f32 * xk_f32, axis=1, keepdims=True)

        @pl.when(k == pl.num_programs(0) - 1)
        def _finalize():
            gram = gram_ref[...]                       # (n, n) f32
            sq_col = sq_ref[...]                       # (n, 1) f32
            sq_row = jnp.transpose(sq_col)             # (1, n): one tiny transpose

            # dist2_ij = sq_i + sq_j - 2*gram_ij ; keep sq_i out of the (n,n)
            # reductions (added to the mined (n,1) vectors afterwards).
            inner = sq_row - 2.0 * gram                # (n, n)

            # Same-label mask from pre-laid-out labels.
            mask = tcol_ref[...] == trow_ref[...]      # (n, n)

            # Batch-hard mining on squared distances (sqrt is monotone).
            ap2 = sq_col + jnp.max(jnp.where(mask, inner, -_BIG),
                                   axis=1, keepdims=True)
            an2 = sq_col + jnp.min(jnp.where(mask, _BIG, inner),
                                   axis=1, keepdims=True)

            # clamp + sqrt only on the mined (n,1) vectors (2n EUP ops, not n^2).
            dist_ap = jnp.sqrt(jnp.maximum(ap2, 1e-12))
            dist_an = jnp.sqrt(jnp.maximum(an2, 1e-12))

            # MarginRankingLoss(margin)(dist_an, dist_ap, y=1), reduction='mean'
            per_row = jnp.maximum(dist_ap - dist_an + margin, 0.0)
            loss_ref[0, 0] = jnp.sum(per_row) * inv_n
            correct_ref[0, 0] = jnp.sum((dist_an >= dist_ap).astype(jnp.int32))

    return kernel


def _vmem_cap_bytes():
    """~85% of this generation's physical VMEM (v7x: 64 MiB/TC; v5e/v6e: 128 MiB)."""
    try:
        cap = int(pltpu.get_tpu_info().vmem_capacity_bytes)
    except Exception:
        cap = 64 << 20  # conservative fallback (v7x per-TensorCore)
    return int(0.85 * cap)


def ori_triplet_loss(inputs, targets, *, margin=MARGIN, gram_dtype=jnp.bfloat16):
    """inputs: (n, d) float; targets: (n,) int. Returns (loss, correct)."""
    n, d = inputs.shape
    x = inputs.astype(gram_dtype)
    t_col = targets.reshape(n, 1).astype(jnp.int32)
    t_row = targets.reshape(1, n).astype(jnp.int32)

    # Fat K tiles: the (n, tk) slab is tiny vs VMEM on every generation, and
    # fewer grid steps cut accumulator read-modify-write + per-step overhead.
    itemsize = jnp.dtype(gram_dtype).itemsize
    tk_target = 1024 if itemsize <= 2 else 512
    if d <= tk_target:
        tk, d_pad = d, d
    else:
        tk = tk_target
        d_pad = tk * pl.cdiv(d, tk)
        x = jnp.pad(x, ((0, 0), (0, d_pad - d)))   # zero-pad: distances unchanged
    num_k = d_pad // tk

    # Explicit VMEM budget from actual footprint, clamped to physical VMEM.
    needed = int(2 * n * tk * itemsize       # double-buffered feature slab
                 + n * n * 4                 # Gram accumulator
                 + n * 4                     # squared-norm accumulator
                 + 4 * n * 4) + (8 << 20)    # labels + headroom
    vmem_bytes = max(16 << 20, min(needed, _vmem_cap_bytes()))

    kernel = _make_triplet_kernel(float(margin), 1.0 / float(n))

    loss, correct = pl.pallas_call(
        kernel,
        out_shape=(
            jax.ShapeDtypeStruct((1, 1), jnp.float32),
            jax.ShapeDtypeStruct((1, 1), jnp.int32),
        ),
        grid_spec=pltpu.PrefetchScalarGridSpec(
            num_scalar_prefetch=0,
            grid=(num_k,),
            in_specs=[
                pl.BlockSpec((n, tk), lambda k: (0, k)),   # feature slab (pipelined)
                pl.BlockSpec((n, 1), lambda k: (0, 0)),    # labels, column layout
                pl.BlockSpec((1, n), lambda k: (0, 0)),    # labels, row layout
            ],
            out_specs=(
                pl.BlockSpec(memory_space=pltpu.SMEM),     # scalar loss
                pl.BlockSpec(memory_space=pltpu.SMEM),     # scalar correct count
            ),
            scratch_shapes=[
                pltpu.VMEM((n, n), jnp.float32),           # Gram accumulator
                pltpu.VMEM((n, 1), jnp.float32),           # |x_i|^2 accumulator
            ],
        ),
        compiler_params=pltpu.CompilerParams(
            dimension_semantics=("arbitrary",),            # K is a reduction axis
            vmem_limit_bytes=vmem_bytes,
        ),
    )(x, t_col, t_row)
    return loss[0, 0], correct[0, 0]


def _reference(inputs, targets, margin=MARGIN):
    # Pure-JAX reference mirroring the PyTorch forward.
    sq = jnp.sum(inputs ** 2, axis=1, keepdims=True)
    dist2 = sq + sq.T - 2.0 * inputs @ inputs.T
    dist = jnp.sqrt(jnp.maximum(dist2, 1e-12))
    mask = targets[:, None] == targets[None, :]
    dist_ap = jnp.max(jnp.where(mask, dist, -_BIG), axis=1)
    dist_an = jnp.min(jnp.where(mask, _BIG, dist), axis=1)
    loss = jnp.mean(jnp.maximum(dist_ap - dist_an + margin, 0.0))
    correct = jnp.sum(dist_an >= dist_ap)
    return loss, correct


if __name__ == "__main__":
    key = jax.random.PRNGKey(0)
    n, feat_dim = 8, 32
    inputs = jax.random.normal(key, (n, feat_dim), dtype=jnp.float32)
    # 4 identities x 2 samples each (each row has >=1 positive and >=1 negative)
    targets = jnp.array([0, 0, 1, 1, 2, 2, 3, 3], dtype=jnp.int32)

    ref_loss, ref_correct = _reference(inputs, targets)

    # Exact-precision path (f32 Gram).
    loss_f32, correct_f32 = ori_triplet_loss(inputs, targets,
                                             gram_dtype=jnp.float32)
    jax.block_until_ready((loss_f32, correct_f32))
    assert jnp.allclose(loss_f32, ref_loss, atol=1e-4), (loss_f32, ref_loss)
    assert int(correct_f32) == int(ref_correct), (correct_f32, ref_correct)

    # Default path: bf16 Gram on the MXU with f32 norm/Gram accumulation.
    loss_bf16, correct_bf16 = ori_triplet_loss(inputs, targets)
    jax.block_until_ready((loss_bf16, correct_bf16))
    assert jnp.allclose(loss_bf16, ref_loss, atol=1e-1), (loss_bf16, ref_loss)

    print("KERNEL_OK")
</pallas_src>

<mosaic_0001>
module attributes {stable_mosaic.version = 11 : i64} {
  func.func @kernel(%arg0: i32, %arg1: memref<8x32xf32, #tpu.memory_space<vmem>>, %arg2: memref<8x1xi32, #tpu.memory_space<vmem>>, %arg3: memref<1x8xi32, #tpu.memory_space<vmem>>, %arg4: memref<1x1xf32, #tpu.memory_space<smem>>, %arg5: memref<1x1xi32, #tpu.memory_space<smem>>, %arg6: memref<8x8xf32, #tpu.memory_space<vmem>>, %arg7: memref<8x1xf32, #tpu.memory_space<vmem>>) attributes {dimension_semantics = [#tpu.dimension_semantics<arbitrary>], iteration_bounds = array<i64: 1>, scalar_prefetch = 0 : i64, scratch_operands = 2 : i64, tpu.core_type = #tpu.core_type<tc>, window_params = [{transform_indices = @transform_0, window_bounds = array<i64: 8, 32>}, {pipeline_mode = #tpu.pipeline_mode<synchronous>, transform_indices = @transform_1, window_bounds = array<i64: 8, 1>}, {pipeline_mode = #tpu.pipeline_mode<synchronous>, transform_indices = @transform_2, window_bounds = array<i64: 1, 8>}, {transform_indices = @transform_3, window_bounds = array<i64: 1, 1>}, {transform_indices = @transform_4, window_bounds = array<i64: 1, 1>}]} {
    %c0_i32 = arith.constant 0 : i32
    %0 = arith.cmpi eq, %arg0, %c0_i32 : i32
    %1 = arith.extui %0 : i1 to i32
    %c0_i32_0 = arith.constant 0 : i32
    %2 = arith.cmpi ne, %1, %c0_i32_0 : i32
    scf.if %2 {
      %cst_13 = arith.constant 0.000000e+00 : f32
      %17 = vector.broadcast %cst_13 : f32 to vector<8x8xf32>
      %c0_14 = arith.constant 0 : index
      %c0_15 = arith.constant 0 : index
      %18 = vector.load %arg6[%c0_14, %c0_15] : memref<8x8xf32, #tpu.memory_space<vmem>>, vector<8x8xf32>
      tpu.vector_store %arg6[%c0_14, %c0_15], %17 {strides = array<i32>} : memref<8x8xf32, #tpu.memory_space<vmem>>, vector<8x8xf32>,
      %cst_16 = arith.constant 0.000000e+00 : f32
      %19 = vector.broadcast %cst_16 : f32 to vector<8x1xf32>
      %c0_17 = arith.constant 0 : index
      %c0_18 = arith.constant 0 : index
      %20 = vector.load %arg7[%c0_17, %c0_18] : memref<8x1xf32, #tpu.memory_space<vmem>>, vector<8x1xf32>
      tpu.vector_store %arg7[%c0_17, %c0_18], %19 {strides = array<i32>} : memref<8x1xf32, #tpu.memory_space<vmem>>, vector<8x1xf32>,
    } else {
    }
    %c0 = arith.constant 0 : index
    %c0_1 = arith.constant 0 : index
    %3 = vector.load %arg1[%c0, %c0_1] : memref<8x32xf32, #tpu.memory_space<vmem>>, vector<8x32xf32>
    %c0_2 = arith.constant 0 : index
    %c0_3 = arith.constant 0 : index
    %4 = vector.load %arg6[%c0_2, %c0_3] : memref<8x8xf32, #tpu.memory_space<vmem>>, vector<8x8xf32>
    %cst = arith.constant dense<0.000000e+00> : vector<8x8xf32>
    %5 = tpu.matmul %3, %3, %cst {dimension_numbers = #tpu.dot_dimension_numbers<[1], [1], [0], [0], [0, 0, 1, 0], [], []>} : vector<8x32xf32>, vector<8x32xf32>, vector<8x8xf32> -> vector<8x8xf32>
    %6 = arith.addf %4, %5 : vector<8x8xf32>
    %c0_4 = arith.constant 0 : index
    %c0_5 = arith.constant 0 : index
    %7 = vector.load %arg6[%c0_4, %c0_5] : memref<8x8xf32, #tpu.memory_space<vmem>>, vector<8x8xf32>
    tpu.vector_store %arg6[%c0_4, %c0_5], %6 {strides = array<i32>} : memref<8x8xf32, #tpu.memory_space<vmem>>, vector<8x8xf32>,
    %c0_6 = arith.constant 0 : index
    %c0_7 = arith.constant 0 : index
    %8 = vector.load %arg7[%c0_6, %c0_7] : memref<8x1xf32, #tpu.memory_space<vmem>>, vector<8x1xf32>
    %9 = arith.mulf %3, %3 : vector<8x32xf32>
    %cst_8 = arith.constant dense<0.000000e+00> : vector<8xf32>
    %10 = vector.multi_reduction <add>, %9, %cst_8 [1] : vector<8x32xf32> to vector<8xf32>
    %11 = vector.shape_cast %10 : vector<8xf32> to vector<8x1xf32>
    %12 = arith.addf %8, %11 : vector<8x1xf32>
    %c0_9 = arith.constant 0 : index
    %c0_10 = arith.constant 0 : index
    %13 = vector.load %arg7[%c0_9, %c0_10] : memref<8x1xf32, #tpu.memory_space<vmem>>, vector<8x1xf32>
    tpu.vector_store %arg7[%c0_9, %c0_10], %12 {strides = array<i32>} : memref<8x1xf32, #tpu.memory_space<vmem>>, vector<8x1xf32>,
    %c0_i32_11 = arith.constant 0 : i32
    %14 = arith.cmpi eq, %arg0, %c0_i32_11 : i32
    %15 = arith.extui %14 : i1 to i32
    %c0_i32_12 = arith.constant 0 : i32
    %16 = arith.cmpi ne, %15, %c0_i32_12 : i32
    scf.if %16 {
      %c0_13 = arith.constant 0 : index
      %c0_14 = arith.constant 0 : index
      %17 = vector.load %arg6[%c0_13, %c0_14] : memref<8x8xf32, #tpu.memory_space<vmem>>, vector<8x8xf32>
      %c0_15 = arith.constant 0 : index
      %c0_16 = arith.constant 0 : index
      %18 = vector.load %arg7[%c0_15, %c0_16] : memref<8x1xf32, #tpu.memory_space<vmem>>, vector<8x1xf32>
      %19 = tpu.transpose %18, [1, 0] : vector<8x1xf32> -> vector<1x8xf32>
      %cst_17 = arith.constant 2.000000e+00 : f32
      %20 = vector.broadcast %cst_17 : f32 to vector<8x8xf32>
      %21 = arith.mulf %20, %17 : vector<8x8xf32>
      %22 = vector.broadcast %19 : vector<1x8xf32> to vector<8x8xf32>
      %23 = arith.subf %22, %21 : vector<8x8xf32>
      %c0_18 = arith.constant 0 : index
      %c0_19 = arith.constant 0 : index
      %24 = vector.load %arg2[%c0_18, %c0_19] : memref<8x1xi32, #tpu.memory_space<vmem>>, vector<8x1xi32>
      %c0_20 = arith.constant 0 : index
      %c0_21 = arith.constant 0 : index
      %25 = vector.load %arg3[%c0_20, %c0_21] : memref<1x8xi32, #tpu.memory_space<vmem>>, vector<1x8xi32>
      %26 = vector.broadcast %24 : vector<8x1xi32> to vector<8x8xi32>
      %27 = vector.broadcast %25 : vector<1x8xi32> to vector<8x8xi32>
      %28 = arith.cmpi eq, %26, %27 : vector<8x8xi32>
      %cst_22 = arith.constant -1.000000e+30 : f32
      %29 = vector.broadcast %cst_22 : f32 to vector<8x8xf32>
      %30 = arith.select %28, %23, %29 : vector<8x8xi1>, vector<8x8xf32>
      %cst_23 = arith.constant dense<0xFF800000> : vector<8xf32>
      %31 = vector.multi_reduction <maximumf>, %30, %cst_23 [1] : vector<8x8xf32> to vector<8xf32>
      %32 = vector.shape_cast %31 : vector<8xf32> to vector<8x1xf32>
      %33 = arith.addf %18, %32 : vector<8x1xf32>
      %cst_24 = arith.constant 1.000000e+30 : f32
      %34 = vector.broadcast %cst_24 : f32 to vector<8x8xf32>
      %35 = arith.select %28, %34, %23 : vector<8x8xi1>, vector<8x8xf32>
      %cst_25 = arith.constant dense<0x7F800000> : vector<8xf32>
      %36 = vector.multi_reduction <minimumf>, %35, %cst_25 [1] : vector<8x8xf32> to vector<8xf32>
      %37 = vector.shape_cast %36 : vector<8xf32> to vector<8x1xf32>
      %38 = arith.addf %18, %37 : vector<8x1xf32>
      %cst_26 = arith.constant 9.99999996E-13 : f32
      %39 = vector.broadcast %cst_26 : f32 to vector<8x1xf32>
      %40 = arith.maximumf %33, %39 : vector<8x1xf32>
      %41 = math.sqrt %40 : vector<8x1xf32>
      %cst_27 = arith.constant 9.99999996E-13 : f32
      %42 = vector.broadcast %cst_27 : f32 to vector<8x1xf32>
      %43 = arith.maximumf %38, %42 : vector<8x1xf32>
      %44 = math.sqrt %43 : vector<8x1xf32>
      %45 = arith.subf %41, %44 : vector<8x1xf32>
      %cst_28 = arith.constant 3.000000e-01 : f32
      %46 = vector.broadcast %cst_28 : f32 to vector<8x1xf32>
      %47 = arith.addf %45, %46 : vector<8x1xf32>
      %cst_29 = arith.constant 0.000000e+00 : f32
      %48 = vector.broadcast %cst_29 : f32 to vector<8x1xf32>
      %49 = arith.maximumf %47, %48 : vector<8x1xf32>
      %50 = vector.shape_cast %49 : vector<8x1xf32> to vector<1x8x1xf32>
      %cst_30 = arith.constant dense<0.000000e+00> : vector<1xf32>
      %51 = vector.multi_reduction <add>, %50, %cst_30 [1, 2] : vector<1x8x1xf32> to vector<1xf32>
      %52 = vector.shape_cast %51 : vector<1xf32> to vector<1x1x1xf32>
      %53 = vector.extract %52[0, 0, 0] : f32 from vector<1x1x1xf32>
      %cst_31 = arith.constant 1.250000e-01 : f32
      %54 = arith.mulf %53, %cst_31 : f32
      %c0_32 = arith.constant 0 : index
      %c0_33 = arith.constant 0 : index
      %55 = memref.load %arg4[%c0_32, %c0_33] : memref<1x1xf32, #tpu.memory_space<smem>>
      memref.store %54, %arg4[%c0_32, %c0_33] : memref<1x1xf32, #tpu.memory_space<smem>>
      %56 = arith.cmpf oge, %44, %41 : vector<8x1xf32>
      %57 = arith.extui %56 : vector<8x1xi1> to vector<8x1xi32>
      %58 = vector.shape_cast %57 : vector<8x1xi32> to vector<1x8x1xi32>
      %cst_34 = arith.constant dense<0> : vector<1xi32>
      %59 = vector.multi_reduction <add>, %58, %cst_34 [1, 2] : vector<1x8x1xi32> to vector<1xi32>
      %60 = vector.shape_cast %59 : vector<1xi32> to vector<1x1x1xi32>
      %61 = vector.extract %60[0, 0, 0] : i32 from vector<1x1x1xi32>
      %c0_35 = arith.constant 0 : index
      %c0_36 = arith.constant 0 : index
      %62 = memref.load %arg5[%c0_35, %c0_36] : memref<1x1xi32, #tpu.memory_space<smem>>
      memref.store %61, %arg5[%c0_35, %c0_36] : memref<1x1xi32, #tpu.memory_space<smem>>
    } else {
    }
    return
  }
  func.func @transform_0(%arg0: i32) -> (i32, i32) {
    %c0_i32 = arith.constant 0 : i32
    %c0_i32_0 = arith.constant 0 : i32
    return %c0_i32, %arg0 : i32, i32
  }
  func.func @transform_1(%arg0: i32) -> (i32, i32) {
    %c0_i32 = arith.constant 0 : i32
    %c0_i32_0 = arith.constant 0 : i32
    %c0_i32_1 = arith.constant 0 : i32
    return %c0_i32, %c0_i32_0 : i32, i32
  }
  func.func @transform_2(%arg0: i32) -> (i32, i32) {
    %c0_i32 = arith.constant 0 : i32
    %c0_i32_0 = arith.constant 0 : i32
    %c0_i32_1 = arith.constant 0 : i32
    return %c0_i32, %c0_i32_0 : i32, i32
  }
  func.func @transform_3(%arg0: i32) -> (i32, i32) {
    %c0_i32 = arith.constant 0 : i32
    %c0_i32_0 = arith.constant 0 : i32
    %c0_i32_1 = arith.constant 0 : i32
    return %c0_i32, %c0_i32_0 : i32, i32
  }
  func.func @transform_4(%arg0: i32) -> (i32, i32) {
    %c0_i32 = arith.constant 0 : i32
    %c0_i32_0 = arith.constant 0 : i32
    %c0_i32_1 = arith.constant 0 : i32
    return %c0_i32, %c0_i32_0 : i32, i32
  }
}

</mosaic_0001>

<bundles_post_ra>
// kernel: tpu_custom_call.1
= control target key start
LH: loop header
LB: loop body
LE: loop exit
PB: predicated region body
PF: predicated region fallthrough
CT: control target
= control target key end

     0   :  { %10 = vsyncpa [#allocation5], 0  ;;  %vm28_vm0 = vcmask 261120   ;;  %vm24_vm1 = vcmask 7168   ;;  %v301_v2 = vmov 0.0   ;;  %vm302_vm2 = vmmov 0   ;;  %s354_s0 = inlined_call_operand.vmem [shape: f32[8,32], index: 0, kind: input, shape index: {}]   ;;  %s355_s1 = inlined_call_operand.vmem [shape: s32[8,1], index: 1, kind: input, shape index: {}]   ;;  %s356_s2 = inlined_call_operand.vmem [shape: s32[1,8], index: 2, kind: input, shape index: {}]   ;;  %s357_s3 = inlined_call_operand.hbm [shape: f32[1,1], index: 3, kind: output, shape index: {0}]   ;;  %s358_s4 = inlined_call_operand.hbm [shape: s32[1,1], index: 4, kind: output, shape index: {1}]  }
   0x1   :  { %v26_v0 = vld [vmem:[%s354_s0] sm:$0xff]  ;;  %25 = vst.msk [vmem:[#allocation3] sm:$0xff] %vm24_vm1, %v301_v2  ;;  %262 = vmatprep.subr.mxu0 %v301_v2  ;;  %264 = vmatprep.mubr.msk.f32.mxu0 %vm302_vm2, %v301_v2 }
   0x2   :  { %v106_v1 = vmul.f32 %v26_v0, %v26_v0 }
   0x3   :  { %11 = vsyncpa [#allocation7], 0  ;;  %263 = vmatpush3.xpose.msk.msra.mxu0 %vm28_vm0, %v26_v0  ;;  %v156_v4 = vld [vmem:[%s355_s1] sm:$0xff]  ;;  %vm22_vm3 = vcmask 64512   ;;  %v303_v5 = vmov 0   ;;  %v151_v14 = vlaneseq  ;;  %s304_s21 = smov [#allocation4]  }
   0x4   :  { %v107_v3 = vsel %vm28_vm0, %v106_v1, 0.0  ;;  %276 = vset.pattern.permute.xlu0 %v303_v5  ;;  %23 = vst.msk [vmem:[#allocation2] sm:$0xff] %vm22_vm3, %v301_v2  ;;  %v259_v19 = vld [vmem:[%s356_s2] ss:$0 sm:$0xff]  ;;  %s305_s24 = smov [#allocation6]  }
   0x5   :  { %108 = vadd.xlane.f32.xlu0 %v107_v3  ;;  %v152_v15 = vshrl.u32 %v151_v14, 7 }
   0x6   :  { %265 = vmatmul.mubr.msk.f32.vlgmr.msra.gmra.mxu0 %vm28_vm0, %v26_v0 }
   0x7   :  { %v153_v17 = vsub.s32 0, %v152_v15 }
   0x8   :  { %v105_v6 = vld [vmem:[#allocation3] sm:$0xff] }
   0xb   :  { %v27_v10 = vld [vmem:[#allocation2] sm:$0xff] }
  0x1b   :  { %159 = vperm.xlu0 %276, %v156_v4  }
  0x8e   :  { %v109_v7 = vpop.xlane.xlu0 %108 }
  0x8f   :  { %v110_v8 = vadd.f32 %v109_v7, %v105_v6 }
  0x91   :  { %112 = vst.msk [vmem:[#allocation3] sm:$0xff] %vm24_vm1, %v110_v8 }
  0x96   :  { %v160_v20 = vpop.permute.xlu0 %159 }
  0x97   :  { %vm165_vm4 = vcmp.eq.s32.totalorder %v160_v20, %v259_v19 }
  0x98   :  { %v117_v9 = vld [vmem:[#allocation3] sm:$0xff] }
  0x99   :  { %118 = vxpose.xlu1.b32.start.end [1/1] (short) (narrow) %v117_v9, 8 }
  0xc6   :  { %v98_v11 = vpop.f32.mrf.mxu0 }
  0xc7   :  { %v102_v12 = vadd.f32 %v98_v11, %v27_v10 }
  0xc8   :  { %v266_v13 = vpop.f32.mrf.mxu0 }
  0xc9   :  { %104 = vst.msk [vmem:[#allocation2] sm:$0xff] %vm22_vm3, %v102_v12 }
  0xd0   :  { %v116_v16 = vld [vmem:[#allocation2] sm:$0xff] }
  0xd1   :  { %v150_v18 = vmul.f32 2.0, %v116_v16 }
 0x115   :  { %v134_v21 = vpop.trf.xlu1 }
 0x116   :  { %v154_v22 = vrot.slane %v134_v21, %v153_v17 }
 0x118   :  { %v155_v23 = vsub.f32 %v154_v22, %v150_v18 }
 0x11a   :  { %v166_v24 = vsel %vm165_vm4, %v155_v23, -1e+30  ;;  %v171_v26 = vsel %vm165_vm4, 1e+30, %v155_v23 }
 0x11b   :  { %v167_v25 = vsel %vm22_vm3, %v166_v24, -inf  ;;  %v172_v27 = vsel %vm22_vm3, %v171_v26, inf }
 0x11c   :  { %168 = vmax.xlane.f32.xlu1 %v167_v25 }
 0x120   :  { %173 = vmin.xlane.f32.xlu1 %v172_v27 }
 0x1a5   :  { %v169_v28 = vpop.xlane.xlu1 %168 }
 0x1a6   :  { %v170_v29 = vadd.f32 %v169_v28, %v117_v9 }
 0x1a8   :  { %v176_v30 = vmax.f32 %v170_v29, 1e-12 }
 0x1a9   :  { %v174_v31 = vpop.xlane.xlu1 %173 }
 0x1aa   :  { %277 = vrsqrt.f32 %v176_v30  ;;  %v175_v32 = vadd.f32 %v174_v31, %v117_v9  ;;  %vm179_vm5 = vcmp.eq.f32.partialorder %v176_v30, inf  ;;  %v182_v39 = vand.u32 2147483648, %v176_v30 }
 0x1ab   :  { %vm181_vm7 = vcmp.eq.f32.partialorder %v176_v30, 0.0 }
 0x1ac   :  { %v184_v33 = vmax.f32 %v175_v32, 1e-12 }
 0x1ae   :  { %279 = vrsqrt.f32 %v184_v33  ;;  %vm187_vm6 = vcmp.eq.f32.partialorder %v184_v33, inf  ;;  %v190_v40 = vand.u32 2147483648, %v184_v33  ;;  %vm189_vm8 = vcmp.eq.f32.partialorder %v184_v33, 0.0 }
 0x1b7   :  { %v278_v34 = vpop.eup %277 }
 0x1b8   :  { %v178_v35 = vmul.f32 %v278_v34, %v176_v30 }
 0x1ba   :  { %v180_v37 = vsel %vm179_vm5, %v176_v30, %v178_v35 }
 0x1bb   :  { %v280_v36 = vpop.eup %279  ;;  %v183_v42 = vsel %vm181_vm7, %v182_v39, %v180_v37 }
 0x1bc   :  { %v186_v38 = vmul.f32 %v280_v36, %v184_v33 }
 0x1be   :  { %v188_v41 = vsel %vm187_vm6, %v184_v33, %v186_v38 }
 0x1bf   :  { %v191_v43 = vsel %vm189_vm8, %v190_v40, %v188_v41 }
 0x1c0   :  { %vm208_vm9 = vcmp.ge.f32.partialorder %v191_v43, %v183_v42  ;;  %v192_v44 = vsub.f32 %v183_v42, %v191_v43 }
 0x1c1   :  { %v209_v45 = vsel %vm208_vm9, 1, %v303_v5 }
 0x1c2   :  { %v210_v46 = vsel %vm24_vm1, %v209_v45, 0  ;;  %v193_v47 = vadd.f32 0.3, %v192_v44 }
 0x1c3   :  { %v212_v48 = vshrl.u32 %v210_v46, 16  ;;  %v211_v49 = vand.u32 65535, %v210_v46 }
 0x1c4   :  { %v194_v52 = vmax.f32 %v193_v47, 0.0 }
 0x1c5   :  { %v214_v50 = vcvt.s32.f32 %v212_v48  ;;  %v213_v51 = vcvt.s32.f32 %v211_v49 }
 0x1c6   :  { %v195_v53 = vsel %vm24_vm1, %v194_v52, 0.0 }
 0x1c7   :  { %217 = vadd.xlane.f32.xlu1 %v214_v50  ;;  %215 = vadd.xlane.f32.xlu0 %v213_v51 }
 0x1cb   :  { %196 = vadd.xlane.f32.xlu1 %v195_v53 }
 0x250   :  { %v218_v54 = vpop.xlane.xlu1 %217  ;;  %v216_v55 = vpop.xlane.xlu0 %215 }
 0x251   :  { %v220_v56 = vcvt.f32.s32 %v218_v54  ;;  %v219_v58 = vcvt.f32.s32 %v216_v55 }
 0x253   :  { %v221_v57 = vshll.u32 %v220_v56, 16 }
 0x254   :  { %v197_v59 = vpop.xlane.xlu1 %196 }
 0x255   :  { %v222_v60 = vadd.s32 %v221_v57, %v219_v58  ;;  %v198_v61 = vrot.slane %v197_v59, 4 }
 0x257   :  { %v223_v62 = vrot.slane %v222_v60, 4  ;;  %v199_v63 = vadd.f32 %v198_v61, %v197_v59 }
 0x259   :  { %v224_v0 = vadd.s32 %v223_v62, %v222_v60  ;;  %v200_v1 = vrot.slane %v199_v63, 2 }
 0x25b   :  { %v201_v2 = vadd.f32 %v200_v1, %v199_v63  ;;  %v225_v3 = vrot.slane %v224_v0, 2 }
 0x25d   :  { %v202_v4 = vrot.slane %v201_v2, 1  ;;  %v226_v5 = vadd.s32 %v225_v3, %v224_v0 }
 0x25f   :  { %v203_v6 = vadd.f32 %v202_v4, %v201_v2  ;;  %v227_v7 = vrot.slane %v226_v5, 1 }
 0x261   :  { %267 = vpush %v203_v6  ;;  %v228_v8 = vadd.s32 %v227_v7, %v226_v5 }
 0x263   :  { %269 = vpush %v228_v8 }
 0x292   :  { %s268_s2 = spop %267 }
 0x293   :  { %s205_s19 = smul.f32 0.125, %s268_s2 }
 0x294   :  { %s270_s20 = spop %269 }
 0x295   :  { %231 = sst [smem:[#allocation6]] %s270_s20 }
 0x296   :  { %207 = sst [smem:[#allocation4]] %s205_s19 }
 0x297   :  { %239 = dma.smem_to_hbm %s304_s21, 16, %s357_s3, [#allocation5]  }
 0x298   :  { %247 = dma.smem_to_hbm %s305_s24, 16, %s358_s4, [#allocation7]  }
 0x299   :  { %297 = dma.done.wait [#allocation5], 16  }
 0x29a   :  { %298 = vsyncadd [#allocation5], 4294967280 }
 0x29b   :  { %299 = dma.done.wait [#allocation7], 16  }
 0x29c   :  { %300 = vsyncadd [#allocation7], 4294967280 }
 0x29d   :  { %254 = sfence }
 0x29e   :  { %255 = vsyncpa [#allocation5], 1 }
 0x29f   :  { %256 = vsyncpa [#allocation7], 1 }

</bundles_post_ra>
